<compile_context>
chip_gen: v6e
topology: v6e:2x2x1
jax: 0.10.0
libtpu: 0.0.40
codegen_flags: <defaults>
</compile_context>

<pallas_src>
import functools

import numpy as np
import jax
import jax.numpy as jnp
from jax import lax
from jax.experimental import pallas as pl
from jax.experimental.pallas import tpu as pltpu


# ----------------------------- fused Pallas kernel -----------------------------

def _criterion_kernel(nv_ref, logits_ref, qmat_ref, lmap_ref, tmask_ref,
                      boxes_ref, out_ref, *, alpha, gamma):
    """Per query-tile pass producing partial loss sums.

    out_ref lanes (sublane 0): 0 focal_sum, 1 bbox_sum, 2 giou_sum, 3 xy_sum,
    4 hw_sum (lanes 1-4 only on grid step 0), 8+b per-batch nonempty counts.
    """
    x = logits_ref[...].astype(jnp.float32)                     # [B, TQ, T]
    B, TQ, T = x.shape

    # one_hot targets rebuilt on the idle MXU: match_matrix @ label_map (exact 0/1)
    tgt = jnp.einsum('bqc,bct->bqt', qmat_ref[...], lmap_ref[...],
                     preferred_element_type=jnp.float32)
    t_pos = tgt > 0.5                                            # boolean targets

    # ---------------- token_sigmoid_binary_focal_loss (select form) ----------------
    e = jnp.exp(-jnp.abs(x))                                     # single transcendental
    one_plus_e = 1.0 + e
    ce = jnp.maximum(x, 0.0) - jnp.where(t_pos, x, 0.0) + jnp.log(one_plus_e)
    inv = pl.reciprocal(one_plus_e, approx=False)                # approx=True if tol allows
    # q == 1 - p_t : equals e/(1+e) when target agrees with sign(x), else 1/(1+e)
    q = jnp.where(t_pos == (x >= 0.0), e, 1.0) * inv
    if gamma == 2.0:                                             # static specialization
        mod = q * q
    else:
        mod = jnp.power(q, gamma)
    loss = ce * mod
    if alpha >= 0:
        loss = loss * jnp.where(t_pos, alpha, 1.0 - alpha)
    m = tmask_ref[...].astype(jnp.float32)                       # [B, T]
    # masked_select(...).sum(): apply the text mask after the Q-reduction
    focal_partial = jnp.sum(jnp.sum(loss, axis=1) * m)

    # ---------------- loss_cardinality (partial per-batch counts) ----------------
    # argmax(-1) != T-1  <=>  max over first T-1 logits >= last logit
    lane_t = lax.broadcasted_iota(jnp.int32, (1, 1, T), 2)
    rest_max = jnp.max(jnp.where(lane_t == T - 1, -jnp.inf, x), axis=-1,
                       keepdims=True)                            # [B, TQ, 1]
    last_val = x[:, :, T - 1:T]                                  # lane slice, no 2nd reduce
    nonempty = (rest_max >= last_val).astype(jnp.float32)        # [B, TQ, 1]

    lane_o = lax.broadcasted_iota(jnp.int32, (1, 8, 128), 2)     # exactly one vreg
    res = jnp.where(lane_o == 0, focal_partial, 0.0)
    for b in range(B):                                           # B is small & static
        res = res + jnp.where(lane_o == 8 + b, jnp.sum(nonempty[b]), 0.0)
    out_ref[...] = res

    # ---------------- loss_boxes (L1 + diag GIoU), first grid step only ----------------
    @pl.when(pl.program_id(0) == 0)
    def _():
        boxes = boxes_ref[...]                                   # [8, MPAD] f32
        MPAD = boxes.shape[1]
        s = boxes[0:4, :]                                        # src cxcywh
        tb = boxes[4:8, :]                                       # tgt cxcywh
        validf = (lax.broadcasted_iota(jnp.int32, (1, MPAD), 1) < nv_ref[0]
                  ).astype(jnp.float32)                          # runtime match count

        l1 = jnp.abs(s - tb) * validf
        bbox_sum = jnp.sum(l1)
        xy_sum = jnp.sum(l1[0:2, :])
        hw_sum = jnp.sum(l1[2:4, :])

        def to_xyxy(bb):
            cx, cy, w, h = bb[0:1, :], bb[1:2, :], bb[2:3, :], bb[3:4, :]
            return cx - 0.5 * w, cy - 0.5 * h, cx + 0.5 * w, cy + 0.5 * h

        sx0, sy0, sx1, sy1 = to_xyxy(s)
        tx0, ty0, tx1, ty1 = to_xyxy(tb)
        area_s = (sx1 - sx0) * (sy1 - sy0)
        area_t = (tx1 - tx0) * (ty1 - ty0)
        inter = (jnp.maximum(jnp.minimum(sx1, tx1) - jnp.maximum(sx0, tx0), 0.0)
                 * jnp.maximum(jnp.minimum(sy1, ty1) - jnp.maximum(sy0, ty0), 0.0))
        union = area_s + area_t - inter
        area_c = (jnp.maximum(jnp.maximum(sx1, tx1) - jnp.minimum(sx0, tx0), 0.0)
                  * jnp.maximum(jnp.maximum(sy1, ty1) - jnp.minimum(sy0, ty0), 0.0))
        # guard denominators on padded lanes (valid lanes are unchanged, no NaN/Inf)
        union_s = jnp.where(validf > 0.0, union, 1.0)
        area_c_s = jnp.where(validf > 0.0, area_c, 1.0)
        giou = inter / union_s - (area_c - union) / area_c_s
        giou_sum = jnp.sum((1.0 - giou) * validf)

        resb = (jnp.where(lane_o == 1, bbox_sum, 0.0)
                + jnp.where(lane_o == 2, giou_sum, 0.0)
                + jnp.where(lane_o == 3, xy_sum, 0.0)
                + jnp.where(lane_o == 4, hw_sum, 0.0))
        out_ref[...] = out_ref[...] + resb


def _pick_tile_q(Q):
    for t in (256, 128, 64, 32, 16, 8):
        if Q % t == 0:
            return t
    return Q  # single full-width block (e.g. Q=900): second-minor == full dim is legal


def fused_criterion(num_valid, pred_logits, qmat, lmap, text_mask_i8,
                    boxes_packed, *, alpha, gamma):
    B, Q, T = pred_logits.shape
    C_pad = qmat.shape[-1]
    MPAD = boxes_packed.shape[-1]
    assert B + 8 <= 128
    TQ = _pick_tile_q(Q)
    nt = Q // TQ

    grid_spec = pltpu.PrefetchScalarGridSpec(
        num_scalar_prefetch=1,                      # num_valid -> SMEM scalar
        grid=(nt,),
        in_specs=[
            pl.BlockSpec((B, TQ, T), lambda i, nv: (0, i, 0)),       # pred_logits
            pl.BlockSpec((B, TQ, C_pad), lambda i, nv: (0, i, 0)),   # match matrix
            pl.BlockSpec((B, C_pad, T), lambda i, nv: (0, 0, 0)),    # label map
            pl.BlockSpec((B, T), lambda i, nv: (0, 0)),              # text mask (int8)
            pl.BlockSpec((8, MPAD), lambda i, nv: (0, 0)),           # packed boxes
        ],
        out_specs=pl.BlockSpec((1, 8, 128), lambda i, nv: (i, 0, 0)),
    )
    return pl.pallas_call(
        functools.partial(_criterion_kernel, alpha=alpha, gamma=gamma),
        grid_spec=grid_spec,
        out_shape=jax.ShapeDtypeStruct((nt, 8, 128), jnp.float32),
        compiler_params=pltpu.CompilerParams(
            dimension_semantics=("parallel",)),      # both v7x TCs split the Q tiles
    )(num_valid, pred_logits, qmat, lmap, text_mask_i8, boxes_packed)


# ----------------------------- SetCriterion glue -----------------------------

def set_criterion_losses(outputs, targets, indices, label_map_list,
                         focal_alpha=0.25, focal_gamma=2.0):
    """Mirrors SetCriterion.forward for losses = ['labels','cardinality','boxes'].

    # TODO(synk): the Hungarian matcher and tokenizer-based create_positive_map
    # (char_to_token) have no Pallas equivalent; `indices` and `label_map_list`
    # are provided deterministically by the caller instead.
    # TODO(synk): torch.distributed all_reduce of num_boxes is omitted (single host).
    # TODO(synk): matched src-box gather stays as a single XLA take (dynamic lane
    # scatter in-kernel is not worth it at this size).
    """
    pred_logits = outputs['pred_logits']   # [B, Q, T]
    pred_boxes = outputs['pred_boxes']     # [B, Q, 4]
    text_mask = outputs['text_mask']       # [B, T] bool
    B, Q, T = pred_logits.shape

    # ---- host-side (numpy) table construction: no XLA scatters / per-batch gathers ----
    C_max = max(int(np.asarray(label_map_list[i]).shape[0]) for i in range(B))
    C_pad = ((C_max + 7) // 8) * 8
    qmat_np = np.zeros((B, Q, C_pad), np.float32)      # match matrix: q -> label one-hot
    lmap_np = np.zeros((B, C_pad, T), np.float32)      # per-batch label -> token rows
    flat_src, tgt_boxes_np = [], []
    for i in range(B):
        src_i = np.asarray(indices[i][0]).astype(np.int64)
        tgt_i = np.asarray(indices[i][1]).astype(np.int64)
        labels_i = np.asarray(targets[i]['labels'])[tgt_i]
        lm = np.asarray(label_map_list[i], np.float32)
        lmap_np[i, :lm.shape[0], :lm.shape[1]] = lm
        qmat_np[i, src_i, labels_i] = 1.0
        flat_src.append(i * Q + src_i)
        tgt_boxes_np.append(np.asarray(targets[i]['boxes'], np.float32)[tgt_i])
    flat_src = (np.concatenate(flat_src).astype(np.int32)
                if flat_src else np.zeros((0,), np.int32))
    tgt_boxes_np = (np.concatenate(tgt_boxes_np, 0)
                    if tgt_boxes_np else np.zeros((0, 4), np.float32))

    M = int(flat_src.shape[0])
    MPAD = 128 * max(1, -(-M // 128))                  # fixed 128-lane buckets
    flat_pad = np.zeros((MPAD,), np.int32); flat_pad[:M] = flat_src
    tgt_pad = np.zeros((MPAD, 4), np.float32); tgt_pad[:M] = tgt_boxes_np

    num_boxes = max(float(sum(len(t['labels']) for t in targets)), 1.0)
    num_pos_avg = max(float(M), 1.0)
    tgt_len_np = np.array([len(t['labels']) for t in targets], np.float32)

    # ---- minimal device-side prep: one gather + concat + transpose ----
    src_g = jnp.take(pred_boxes.reshape(B * Q, 4), jnp.asarray(flat_pad), axis=0)
    boxes_packed = jnp.concatenate([src_g, jnp.asarray(tgt_pad)], axis=1).T  # [8, MPAD]
    boxes_packed = boxes_packed.astype(jnp.float32)

    out = fused_criterion(
        jnp.asarray([M], jnp.int32),                   # runtime scalar, no recompile
        pred_logits, jnp.asarray(qmat_np), jnp.asarray(lmap_np),
        text_mask.astype(jnp.int8), boxes_packed,
        alpha=focal_alpha, gamma=focal_gamma)

    row = jnp.sum(out[:, 0, :], axis=0)                # fold per-tile partials
    focal_sum = row[0]
    bbox_sum = row[1]
    giou_sum = row[2]
    xy_sum = row[3]
    hw_sum = row[4]
    card_counts = row[8:8 + B]
    card_err = jnp.mean(jnp.abs(card_counts - jnp.asarray(tgt_len_np)))

    return {
        'loss_ce': focal_sum / num_pos_avg,
        'cardinality_error': card_err,
        'loss_bbox': bbox_sum / num_boxes,
        'loss_giou': giou_sum / num_boxes,
        'loss_xy': xy_sum / num_boxes,
        'loss_hw': hw_sum / num_boxes,
    }


# ----------------------------- reference (plain JAX) -----------------------------

def _ref_losses(outputs, targets, indices, label_map_list, alpha, gamma):
    pred_logits = outputs['pred_logits']
    pred_boxes = outputs['pred_boxes']
    text_mask = outputs['text_mask']
    B, Q, T = pred_logits.shape

    one_hot = jnp.zeros((B, Q, T), jnp.float32)
    for i in range(B):
        src_i = np.asarray(indices[i][0])
        tgt_i = np.asarray(indices[i][1])
        tgt_ids_i = np.asarray(targets[i]['labels'])[tgt_i]
        one_hot = one_hot.at[i, src_i].set(jnp.asarray(label_map_list[i][tgt_ids_i]))

    num_boxes = max(float(sum(len(t['labels']) for t in targets)), 1.0)
    num_pos_avg = max(float(sum(len(ind[0]) for ind in indices)), 1.0)

    x = pred_logits.astype(jnp.float32)
    t = one_hot
    m = jnp.broadcast_to(text_mask[:, None, :], (B, Q, T)).astype(jnp.float32)
    p = jax.nn.sigmoid(x)
    ce = jnp.maximum(x, 0.0) - x * t + jnp.log(1.0 + jnp.exp(-jnp.abs(x)))
    p_t = p * t + (1.0 - p) * (1.0 - t)
    loss = ce * jnp.power(1.0 - p_t, gamma)
    loss = (alpha * t + (1.0 - alpha) * (1.0 - t)) * loss
    loss_ce = jnp.sum(loss * m) / num_pos_avg

    card_pred = jnp.sum((jnp.argmax(x, axis=-1) != T - 1).astype(jnp.float32), axis=1)
    tgt_len = jnp.array([len(tg['labels']) for tg in targets], jnp.float32)
    card_err = jnp.mean(jnp.abs(card_pred - tgt_len))

    src = jnp.concatenate([pred_boxes[i][np.asarray(indices[i][0])] for i in range(B)], 0)
    tgt = jnp.concatenate([targets[i]['boxes'][np.asarray(indices[i][1])] for i in range(B)], 0)
    l1 = jnp.abs(src - tgt)

    def xyxy(b):
        return jnp.stack([b[:, 0] - 0.5 * b[:, 2], b[:, 1] - 0.5 * b[:, 3],
                          b[:, 0] + 0.5 * b[:, 2], b[:, 1] + 0.5 * b[:, 3]], -1)

    sb, tb = xyxy(src), xyxy(tgt)
    area_s = (sb[:, 2] - sb[:, 0]) * (sb[:, 3] - sb[:, 1])
    area_t = (tb[:, 2] - tb[:, 0]) * (tb[:, 3] - tb[:, 1])
    iw = jnp.maximum(jnp.minimum(sb[:, 2], tb[:, 2]) - jnp.maximum(sb[:, 0], tb[:, 0]), 0.0)
    ih = jnp.maximum(jnp.minimum(sb[:, 3], tb[:, 3]) - jnp.maximum(sb[:, 1], tb[:, 1]), 0.0)
    inter = iw * ih
    union = area_s + area_t - inter
    iou = inter / union
    ew = jnp.maximum(sb[:, 2], tb[:, 2]) - jnp.minimum(sb[:, 0], tb[:, 0])
    eh = jnp.maximum(sb[:, 3], tb[:, 3]) - jnp.minimum(sb[:, 1], tb[:, 1])
    area_c = jnp.maximum(ew, 0.0) * jnp.maximum(eh, 0.0)
    giou = iou - (area_c - union) / area_c

    return {
        'loss_ce': loss_ce,
        'cardinality_error': card_err,
        'loss_bbox': jnp.sum(l1) / num_boxes,
        'loss_giou': jnp.sum(1.0 - giou) / num_boxes,
        'loss_xy': jnp.sum(l1[:, :2]) / num_boxes,
        'loss_hw': jnp.sum(l1[:, 2:]) / num_boxes,
    }


# ----------------------------- main -----------------------------

if __name__ == "__main__":
    key = jax.random.PRNGKey(0)
    B, Q, T = 2, 16, 256          # batch, num_queries, max_text_len
    focal_alpha, focal_gamma = 0.25, 2.0

    k1, k2, k3, k4 = jax.random.split(key, 4)

    pred_logits = jax.random.normal(k1, (B, Q, T), jnp.float32)
    # pred boxes in cxcywh, normalized and positive
    cxcy = jax.random.uniform(k2, (B, Q, 2), jnp.float32, 0.2, 0.8)
    wh = jax.random.uniform(k3, (B, Q, 2), jnp.float32, 0.1, 0.4)
    pred_boxes = jnp.concatenate([cxcy, wh], axis=-1)

    # text mask: first 24 tokens are real text tokens
    text_mask_np = np.zeros((B, T), dtype=bool)
    text_mask_np[:, :24] = True
    text_mask = jnp.asarray(text_mask_np)

    # synthetic label_map_list (replaces tokenizer-based create_positive_map):
    # category c maps to tokens [1 + 4c, 1 + 4c + 2]
    num_cats = 3
    label_map = np.zeros((num_cats, T), dtype=np.float32)
    for c in range(num_cats):
        label_map[c, 1 + 4 * c: 1 + 4 * c + 3] = 1.0
    label_map_list = [label_map, label_map]

    # targets (labels + cxcywh boxes)
    kb1, kb2 = jax.random.split(k4)
    targets = [
        {'labels': np.array([0, 2, 1], np.int32),
         'boxes': jnp.concatenate(
             [jax.random.uniform(kb1, (3, 2), jnp.float32, 0.2, 0.8),
              jax.random.uniform(kb1, (3, 2), jnp.float32, 0.1, 0.4)], axis=-1)},
        {'labels': np.array([1, 0], np.int32),
         'boxes': jnp.concatenate(
             [jax.random.uniform(kb2, (2, 2), jnp.float32, 0.2, 0.8),
              jax.random.uniform(kb2, (2, 2), jnp.float32, 0.1, 0.4)], axis=-1)},
    ]

    # deterministic synthetic matcher output (src_query_idx, tgt_box_idx) per batch
    # TODO(synk): real Hungarian matcher not implemented.
    indices = [
        (np.array([2, 5, 9], np.int32), np.array([0, 1, 2], np.int32)),
        (np.array([1, 7], np.int32), np.array([1, 0], np.int32)),
    ]

    outputs = {'pred_logits': pred_logits, 'pred_boxes': pred_boxes,
               'text_mask': text_mask}

    losses = set_criterion_losses(outputs, targets, indices, label_map_list,
                                  focal_alpha=focal_alpha, focal_gamma=focal_gamma)
    losses = jax.tree_util.tree_map(jax.block_until_ready, losses)

    ref = _ref_losses(outputs, targets, indices, label_map_list,
                      focal_alpha, focal_gamma)
    for k in losses:
        np.testing.assert_allclose(np.asarray(losses[k]), np.asarray(ref[k]),
                                   rtol=1e-3, atol=1e-4)

    print("KERNEL_OK")
</pallas_src>

<mosaic_0001>
module attributes {stable_mosaic.version = 11 : i64} {
  func.func @_criterion_kernel(%arg0: i32, %arg1: memref<1xi32, #tpu.memory_space<smem>>, %arg2: memref<2x16x256xf32, #tpu.memory_space<vmem>>, %arg3: memref<2x16x8xf32, #tpu.memory_space<vmem>>, %arg4: memref<2x8x256xf32, #tpu.memory_space<vmem>>, %arg5: memref<2x256xi8, #tpu.memory_space<vmem>>, %arg6: memref<8x128xf32, #tpu.memory_space<vmem>>, %arg7: memref<1x8x128xf32, #tpu.memory_space<vmem>>) attributes {dimension_semantics = [#tpu.dimension_semantics<parallel>], iteration_bounds = array<i64: 1>, scalar_prefetch = 1 : i64, scratch_operands = 0 : i64, tpu.core_type = #tpu.core_type<tc>, window_params = [{transform_indices = @transform_0, window_bounds = array<i64: 2, 16, 256>}, {transform_indices = @transform_1, window_bounds = array<i64: 2, 16, 8>}, {pipeline_mode = #tpu.pipeline_mode<synchronous>, transform_indices = @transform_2, window_bounds = array<i64: 2, 8, 256>}, {pipeline_mode = #tpu.pipeline_mode<synchronous>, transform_indices = @transform_3, window_bounds = array<i64: 2, 256>}, {pipeline_mode = #tpu.pipeline_mode<synchronous>, transform_indices = @transform_4, window_bounds = array<i64: 8, 128>}, {transform_indices = @transform_5, window_bounds = array<i64: 1, 8, 128>}]} {
    %c0 = arith.constant 0 : index
    %c0_0 = arith.constant 0 : index
    %c0_1 = arith.constant 0 : index
    %0 = vector.load %arg2[%c0, %c0_0, %c0_1] : memref<2x16x256xf32, #tpu.memory_space<vmem>>, vector<2x16x256xf32>
    %c0_2 = arith.constant 0 : index
    %c0_3 = arith.constant 0 : index
    %c0_4 = arith.constant 0 : index
    %1 = vector.load %arg3[%c0_2, %c0_3, %c0_4] : memref<2x16x8xf32, #tpu.memory_space<vmem>>, vector<2x16x8xf32>
    %c0_5 = arith.constant 0 : index
    %c0_6 = arith.constant 0 : index
    %c0_7 = arith.constant 0 : index
    %2 = vector.load %arg4[%c0_5, %c0_6, %c0_7] : memref<2x8x256xf32, #tpu.memory_space<vmem>>, vector<2x8x256xf32>
    "tpu.trace_start"() <{level = 10 : i32, message = "bqc,bct->bqt"}> : () -> ()
    %cst = arith.constant dense<0.000000e+00> : vector<2x16x256xf32>
    %3 = tpu.matmul %1, %2, %cst {dimension_numbers = #tpu.dot_dimension_numbers<[2], [1], [1], [2], [0, 0, 0, 1, 1, 2], [0], [0]>} : vector<2x16x8xf32>, vector<2x8x256xf32>, vector<2x16x256xf32> -> vector<2x16x256xf32>
    %cst_8 = arith.constant 5.000000e-01 : f32
    "tpu.trace_stop"() : () -> ()
    %4 = vector.broadcast %cst_8 : f32 to vector<2x16x256xf32>
    %5 = arith.cmpf ogt, %3, %4 : vector<2x16x256xf32>
    %6 = math.absf %0 : vector<2x16x256xf32>
    %cst_9 = arith.constant 0.000000e+00 : f32
    %7 = vector.broadcast %cst_9 : f32 to vector<2x16x256xf32>
    %8 = arith.subf %7, %6 : vector<2x16x256xf32>
    %9 = math.exp %8 : vector<2x16x256xf32>
    %cst_10 = arith.constant 1.000000e+00 : f32
    %10 = vector.broadcast %cst_10 : f32 to vector<2x16x256xf32>
    %11 = arith.addf %10, %9 : vector<2x16x256xf32>
    %cst_11 = arith.constant 0.000000e+00 : f32
    %12 = vector.broadcast %cst_11 : f32 to vector<2x16x256xf32>
    %13 = arith.maximumf %0, %12 : vector<2x16x256xf32>
    %cst_12 = arith.constant 0.000000e+00 : f32
    %14 = vector.broadcast %cst_12 : f32 to vector<2x16x256xf32>
    %15 = arith.select %5, %0, %14 : vector<2x16x256xi1>, vector<2x16x256xf32>
    %16 = arith.subf %13, %15 : vector<2x16x256xf32>
    %17 = math.log %11 : vector<2x16x256xf32>
    %18 = arith.addf %16, %17 : vector<2x16x256xf32>
    %19 = tpu.reciprocal %11 : vector<2x16x256xf32> -> vector<2x16x256xf32>
    %cst_13 = arith.constant 0.000000e+00 : f32
    %20 = vector.broadcast %cst_13 : f32 to vector<2x16x256xf32>
    %21 = arith.cmpf oge, %0, %20 : vector<2x16x256xf32>
    %22 = arith.xori %5, %21 : vector<2x16x256xi1>
    %cst_14 = arith.constant dense<true> : vector<2x16x256xi1>
    %23 = arith.xori %22, %cst_14 : vector<2x16x256xi1>
    %cst_15 = arith.constant 1.000000e+00 : f32
    %24 = vector.broadcast %cst_15 : f32 to vector<2x16x256xf32>
    %25 = arith.select %23, %9, %24 : vector<2x16x256xi1>, vector<2x16x256xf32>
    %26 = arith.mulf %25, %19 : vector<2x16x256xf32>
    %27 = arith.mulf %26, %26 : vector<2x16x256xf32>
    %28 = arith.mulf %18, %27 : vector<2x16x256xf32>
    %cst_16 = arith.constant 2.500000e-01 : f32
    %cst_17 = arith.constant 7.500000e-01 : f32
    %29 = vector.broadcast %cst_16 : f32 to vector<2x16x256xf32>
    %30 = vector.broadcast %cst_17 : f32 to vector<2x16x256xf32>
    %31 = arith.select %5, %29, %30 : vector<2x16x256xi1>, vector<2x16x256xf32>
    %32 = arith.mulf %28, %31 : vector<2x16x256xf32>
    %c0_18 = arith.constant 0 : index
    %c0_19 = arith.constant 0 : index
    %33 = vector.load %arg5[%c0_18, %c0_19] : memref<2x256xi8, #tpu.memory_space<vmem>>, vector<2x256xi8>
    %34 = arith.sitofp %33 : vector<2x256xi8> to vector<2x256xf32>
    %cst_20 = arith.constant dense<0.000000e+00> : vector<2x256xf32>
    %35 = vector.multi_reduction <add>, %32, %cst_20 [1] : vector<2x16x256xf32> to vector<2x256xf32>
    %36 = arith.mulf %35, %34 : vector<2x256xf32>
    %37 = vector.shape_cast %36 : vector<2x256xf32> to vector<1x2x256xf32>
    %cst_21 = arith.constant dense<0.000000e+00> : vector<1xf32>
    %38 = vector.multi_reduction <add>, %37, %cst_21 [1, 2] : vector<1x2x256xf32> to vector<1xf32>
    %39 = vector.shape_cast %38 : vector<1xf32> to vector<1x1x1xf32>
    %40 = vector.extract %39[0, 0, 0] : f32 from vector<1x1x1xf32>
    %41 = tpu.iota {dimensions = array<i32: 2>} : vector<1x1x256xi32>
    %c255_i32 = arith.constant 255 : i32
    %42 = vector.broadcast %c255_i32 : i32 to vector<1x1x256xi32>
    %43 = arith.cmpi eq, %41, %42 : vector<1x1x256xi32>
    %cst_22 = arith.constant 0xFF800000 : f32
    %44 = vector.shape_cast %43 : vector<1x1x256xi1> to vector<1x1x256xi1>
    %45 = vector.broadcast %44 : vector<1x1x256xi1> to vector<2x16x256xi1>
    %46 = vector.broadcast %cst_22 : f32 to vector<2x16x256xf32>
    %47 = arith.select %45, %46, %0 : vector<2x16x256xi1>, vector<2x16x256xf32>
    %cst_23 = arith.constant dense<0xFF800000> : vector<2x16xf32>
    %48 = vector.multi_reduction <maximumf>, %47, %cst_23 [2] : vector<2x16x256xf32> to vector<2x16xf32>
    %49 = vector.shape_cast %48 : vector<2x16xf32> to vector<2x16x1xf32>
    %50 = vector.extract_strided_slice %0 {offsets = [0, 0, 255], sizes = [2, 16, 1], strides = [1, 1, 1]} : vector<2x16x256xf32> to vector<2x16x1xf32>
    %51 = arith.cmpf oge, %49, %50 : vector<2x16x1xf32>
    %52 = arith.extui %51 : vector<2x16x1xi1> to vector<2x16x1xi32>
    %53 = arith.sitofp %52 : vector<2x16x1xi32> to vector<2x16x1xf32>
    %54 = tpu.iota {dimensions = array<i32: 2>} : vector<1x8x128xi32>
    %c0_i32 = arith.constant 0 : i32
    %55 = vector.broadcast %c0_i32 : i32 to vector<1x8x128xi32>
    %56 = arith.cmpi eq, %54, %55 : vector<1x8x128xi32>
    %cst_24 = arith.constant 0.000000e+00 : f32
    %57 = vector.broadcast %40 : f32 to vector<1x8x128xf32>
    %58 = vector.broadcast %cst_24 : f32 to vector<1x8x128xf32>
    %59 = arith.select %56, %57, %58 : vector<1x8x128xi1>, vector<1x8x128xf32>
    %c8_i32 = arith.constant 8 : i32
    %60 = vector.broadcast %c8_i32 : i32 to vector<1x8x128xi32>
    %61 = arith.cmpi eq, %54, %60 : vector<1x8x128xi32>
    %62 = vector.extract_strided_slice %53 {offsets = [0, 0, 0], sizes = [1, 16, 1], strides = [1, 1, 1]} : vector<2x16x1xf32> to vector<1x16x1xf32>
    %63 = vector.shape_cast %62 : vector<1x16x1xf32> to vector<16x1xf32>
    %64 = vector.shape_cast %63 : vector<16x1xf32> to vector<1x16x1xf32>
    %cst_25 = arith.constant dense<0.000000e+00> : vector<1xf32>
    %65 = vector.multi_reduction <add>, %64, %cst_25 [1, 2] : vector<1x16x1xf32> to vector<1xf32>
    %66 = vector.shape_cast %65 : vector<1xf32> to vector<1x1x1xf32>
    %67 = vector.extract %66[0, 0, 0] : f32 from vector<1x1x1xf32>
    %cst_26 = arith.constant 0.000000e+00 : f32
    %68 = vector.broadcast %67 : f32 to vector<1x8x128xf32>
    %69 = vector.broadcast %cst_26 : f32 to vector<1x8x128xf32>
    %70 = arith.select %61, %68, %69 : vector<1x8x128xi1>, vector<1x8x128xf32>
    %71 = arith.addf %59, %70 : vector<1x8x128xf32>
    %c9_i32 = arith.constant 9 : i32
    %72 = vector.broadcast %c9_i32 : i32 to vector<1x8x128xi32>
    %73 = arith.cmpi eq, %54, %72 : vector<1x8x128xi32>
    %74 = vector.extract_strided_slice %53 {offsets = [1, 0, 0], sizes = [1, 16, 1], strides = [1, 1, 1]} : vector<2x16x1xf32> to vector<1x16x1xf32>
    %75 = vector.shape_cast %74 : vector<1x16x1xf32> to vector<16x1xf32>
    %76 = vector.shape_cast %75 : vector<16x1xf32> to vector<1x16x1xf32>
    %cst_27 = arith.constant dense<0.000000e+00> : vector<1xf32>
    %77 = vector.multi_reduction <add>, %76, %cst_27 [1, 2] : vector<1x16x1xf32> to vector<1xf32>
    %78 = vector.shape_cast %77 : vector<1xf32> to vector<1x1x1xf32>
    %79 = vector.extract %78[0, 0, 0] : f32 from vector<1x1x1xf32>
    %cst_28 = arith.constant 0.000000e+00 : f32
    %80 = vector.broadcast %79 : f32 to vector<1x8x128xf32>
    %81 = vector.broadcast %cst_28 : f32 to vector<1x8x128xf32>
    %82 = arith.select %73, %80, %81 : vector<1x8x128xi1>, vector<1x8x128xf32>
    %83 = arith.addf %71, %82 : vector<1x8x128xf32>
    %c0_29 = arith.constant 0 : index
    %c0_30 = arith.constant 0 : index
    %c0_31 = arith.constant 0 : index
    %84 = vector.load %arg7[%c0_29, %c0_30, %c0_31] : memref<1x8x128xf32, #tpu.memory_space<vmem>>, vector<1x8x128xf32>
    tpu.vector_store %arg7[%c0_29, %c0_30, %c0_31], %83 {strides = array<i32>} : memref<1x8x128xf32, #tpu.memory_space<vmem>>, vector<1x8x128xf32>,
    %c0_i32_32 = arith.constant 0 : i32
    %85 = arith.cmpi eq, %arg0, %c0_i32_32 : i32
    %86 = arith.extui %85 : i1 to i32
    %c0_i32_33 = arith.constant 0 : i32
    %87 = arith.cmpi ne, %86, %c0_i32_33 : i32
    scf.if %87 {
      %c0_34 = arith.constant 0 : index
      %c0_35 = arith.constant 0 : index
      %88 = vector.load %arg6[%c0_34, %c0_35] : memref<8x128xf32, #tpu.memory_space<vmem>>, vector<8x128xf32>
      %89 = vector.extract_strided_slice %88 {offsets = [0, 0], sizes = [4, 128], strides = [1, 1]} : vector<8x128xf32> to vector<4x128xf32>
      %90 = vector.extract_strided_slice %88 {offsets = [4, 0], sizes = [4, 128], strides = [1, 1]} : vector<8x128xf32> to vector<4x128xf32>
      %91 = tpu.iota {dimensions = array<i32: 1>} : vector<1x128xi32>
      %c0_36 = arith.constant 0 : index
      %92 = memref.load %arg1[%c0_36] : memref<1xi32, #tpu.memory_space<smem>>
      %93 = vector.broadcast %92 : i32 to vector<1x128xi32>
      %94 = arith.cmpi slt, %91, %93 : vector<1x128xi32>
      %95 = arith.extui %94 : vector<1x128xi1> to vector<1x128xi32>
      %96 = arith.sitofp %95 : vector<1x128xi32> to vector<1x128xf32>
      %97 = arith.subf %89, %90 : vector<4x128xf32>
      %98 = math.absf %97 : vector<4x128xf32>
      %99 = vector.broadcast %96 : vector<1x128xf32> to vector<4x128xf32>
      %100 = arith.mulf %98, %99 : vector<4x128xf32>
      %101 = vector.shape_cast %100 : vector<4x128xf32> to vector<1x4x128xf32>
      %cst_37 = arith.constant dense<0.000000e+00> : vector<1xf32>
      %102 = vector.multi_reduction <add>, %101, %cst_37 [1, 2] : vector<1x4x128xf32> to vector<1xf32>
      %103 = vector.shape_cast %102 : vector<1xf32> to vector<1x1x1xf32>
      %104 = vector.extract %103[0, 0, 0] : f32 from vector<1x1x1xf32>
      %105 = vector.extract_strided_slice %100 {offsets = [0, 0], sizes = [2, 128], strides = [1, 1]} : vector<4x128xf32> to vector<2x128xf32>
      %106 = vector.shape_cast %105 : vector<2x128xf32> to vector<1x2x128xf32>
      %cst_38 = arith.constant dense<0.000000e+00> : vector<1xf32>
      %107 = vector.multi_reduction <add>, %106, %cst_38 [1, 2] : vector<1x2x128xf32> to vector<1xf32>
      %108 = vector.shape_cast %107 : vector<1xf32> to vector<1x1x1xf32>
      %109 = vector.extract %108[0, 0, 0] : f32 from vector<1x1x1xf32>
      %110 = vector.extract_strided_slice %100 {offsets = [2, 0], sizes = [2, 128], strides = [1, 1]} : vector<4x128xf32> to vector<2x128xf32>
      %111 = vector.shape_cast %110 : vector<2x128xf32> to vector<1x2x128xf32>
      %cst_39 = arith.constant dense<0.000000e+00> : vector<1xf32>
      %112 = vector.multi_reduction <add>, %111, %cst_39 [1, 2] : vector<1x2x128xf32> to vector<1xf32>
      %113 = vector.shape_cast %112 : vector<1xf32> to vector<1x1x1xf32>
      %114 = vector.extract %113[0, 0, 0] : f32 from vector<1x1x1xf32>
      %115 = vector.extract_strided_slice %89 {offsets = [0, 0], sizes = [1, 128], strides = [1, 1]} : vector<4x128xf32> to vector<1x128xf32>
      %116 = vector.extract_strided_slice %89 {offsets = [1, 0], sizes = [1, 128], strides = [1, 1]} : vector<4x128xf32> to vector<1x128xf32>
      %117 = vector.extract_strided_slice %89 {offsets = [2, 0], sizes = [1, 128], strides = [1, 1]} : vector<4x128xf32> to vector<1x128xf32>
      %118 = vector.extract_strided_slice %89 {offsets = [3, 0], sizes = [1, 128], strides = [1, 1]} : vector<4x128xf32> to vector<1x128xf32>
      %cst_40 = arith.constant 5.000000e-01 : f32
      %119 = vector.broadcast %cst_40 : f32 to vector<1x128xf32>
      %120 = arith.mulf %119, %117 : vector<1x128xf32>
      %121 = arith.subf %115, %120 : vector<1x128xf32>
      %cst_41 = arith.constant 5.000000e-01 : f32
      %122 = vector.broadcast %cst_41 : f32 to vector<1x128xf32>
      %123 = arith.mulf %122, %118 : vector<1x128xf32>
      %124 = arith.subf %116, %123 : vector<1x128xf32>
      %cst_42 = arith.constant 5.000000e-01 : f32
      %125 = vector.broadcast %cst_42 : f32 to vector<1x128xf32>
      %126 = arith.mulf %125, %117 : vector<1x128xf32>
      %127 = arith.addf %115, %126 : vector<1x128xf32>
      %cst_43 = arith.constant 5.000000e-01 : f32
      %128 = vector.broadcast %cst_43 : f32 to vector<1x128xf32>
      %129 = arith.mulf %128, %118 : vector<1x128xf32>
      %130 = arith.addf %116, %129 : vector<1x128xf32>
      %131 = vector.extract_strided_slice %90 {offsets = [0, 0], sizes = [1, 128], strides = [1, 1]} : vector<4x128xf32> to vector<1x128xf32>
      %132 = vector.extract_strided_slice %90 {offsets = [1, 0], sizes = [1, 128], strides = [1, 1]} : vector<4x128xf32> to vector<1x128xf32>
      %133 = vector.extract_strided_slice %90 {offsets = [2, 0], sizes = [1, 128], strides = [1, 1]} : vector<4x128xf32> to vector<1x128xf32>
      %134 = vector.extract_strided_slice %90 {offsets = [3, 0], sizes = [1, 128], strides = [1, 1]} : vector<4x128xf32> to vector<1x128xf32>
      %cst_44 = arith.constant 5.000000e-01 : f32
      %135 = vector.broadcast %cst_44 : f32 to vector<1x128xf32>
      %136 = arith.mulf %135, %133 : vector<1x128xf32>
      %137 = arith.subf %131, %136 : vector<1x128xf32>
      %cst_45 = arith.constant 5.000000e-01 : f32
      %138 = vector.broadcast %cst_45 : f32 to vector<1x128xf32>
      %139 = arith.mulf %138, %134 : vector<1x128xf32>
      %140 = arith.subf %132, %139 : vector<1x128xf32>
      %cst_46 = arith.constant 5.000000e-01 : f32
      %141 = vector.broadcast %cst_46 : f32 to vector<1x128xf32>
      %142 = arith.mulf %141, %133 : vector<1x128xf32>
      %143 = arith.addf %131, %142 : vector<1x128xf32>
      %cst_47 = arith.constant 5.000000e-01 : f32
      %144 = vector.broadcast %cst_47 : f32 to vector<1x128xf32>
      %145 = arith.mulf %144, %134 : vector<1x128xf32>
      %146 = arith.addf %132, %145 : vector<1x128xf32>
      %147 = arith.subf %127, %121 : vector<1x128xf32>
      %148 = arith.subf %130, %124 : vector<1x128xf32>
      %149 = arith.mulf %147, %148 : vector<1x128xf32>
      %150 = arith.subf %143, %137 : vector<1x128xf32>
      %151 = arith.subf %146, %140 : vector<1x128xf32>
      %152 = arith.mulf %150, %151 : vector<1x128xf32>
      %153 = arith.minimumf %127, %143 : vector<1x128xf32>
      %154 = arith.maximumf %121, %137 : vector<1x128xf32>
      %155 = arith.subf %153, %154 : vector<1x128xf32>
      %cst_48 = arith.constant 0.000000e+00 : f32
      %156 = vector.broadcast %cst_48 : f32 to vector<1x128xf32>
      %157 = arith.maximumf %155, %156 : vector<1x128xf32>
      %158 = arith.minimumf %130, %146 : vector<1x128xf32>
      %159 = arith.maximumf %124, %140 : vector<1x128xf32>
      %160 = arith.subf %158, %159 : vector<1x128xf32>
      %cst_49 = arith.constant 0.000000e+00 : f32
      %161 = vector.broadcast %cst_49 : f32 to vector<1x128xf32>
      %162 = arith.maximumf %160, %161 : vector<1x128xf32>
      %163 = arith.mulf %157, %162 : vector<1x128xf32>
      %164 = arith.addf %149, %152 : vector<1x128xf32>
      %165 = arith.subf %164, %163 : vector<1x128xf32>
      %166 = arith.maximumf %127, %143 : vector<1x128xf32>
      %167 = arith.minimumf %121, %137 : vector<1x128xf32>
      %168 = arith.subf %166, %167 : vector<1x128xf32>
      %cst_50 = arith.constant 0.000000e+00 : f32
      %169 = vector.broadcast %cst_50 : f32 to vector<1x128xf32>
      %170 = arith.maximumf %168, %169 : vector<1x128xf32>
      %171 = arith.maximumf %130, %146 : vector<1x128xf32>
      %172 = arith.minimumf %124, %140 : vector<1x128xf32>
      %173 = arith.subf %171, %172 : vector<1x128xf32>
      %cst_51 = arith.constant 0.000000e+00 : f32
      %174 = vector.broadcast %cst_51 : f32 to vector<1x128xf32>
      %175 = arith.maximumf %173, %174 : vector<1x128xf32>
      %176 = arith.mulf %170, %175 : vector<1x128xf32>
      %cst_52 = arith.constant 0.000000e+00 : f32
      %177 = vector.broadcast %cst_52 : f32 to vector<1x128xf32>
      %178 = arith.cmpf ogt, %96, %177 : vector<1x128xf32>
      %cst_53 = arith.constant 1.000000e+00 : f32
      %179 = vector.broadcast %cst_53 : f32 to vector<1x128xf32>
      %180 = arith.select %178, %165, %179 : vector<1x128xi1>, vector<1x128xf32>
      %cst_54 = arith.constant 0.000000e+00 : f32
      %181 = vector.broadcast %cst_54 : f32 to vector<1x128xf32>
      %182 = arith.cmpf ogt, %96, %181 : vector<1x128xf32>
      %cst_55 = arith.constant 1.000000e+00 : f32
      %183 = vector.broadcast %cst_55 : f32 to vector<1x128xf32>
      %184 = arith.select %182, %176, %183 : vector<1x128xi1>, vector<1x128xf32>
      %185 = arith.divf %163, %180 : vector<1x128xf32>
      %186 = arith.subf %176, %165 : vector<1x128xf32>
      %187 = arith.divf %186, %184 : vector<1x128xf32>
      %188 = arith.subf %185, %187 : vector<1x128xf32>
      %cst_56 = arith.constant 1.000000e+00 : f32
      %189 = vector.broadcast %cst_56 : f32 to vector<1x128xf32>
      %190 = arith.subf %189, %188 : vector<1x128xf32>
      %191 = arith.mulf %190, %96 : vector<1x128xf32>
      %192 = vector.shape_cast %191 : vector<1x128xf32> to vector<1x1x128xf32>
      %cst_57 = arith.constant dense<0.000000e+00> : vector<1xf32>
      %193 = vector.multi_reduction <add>, %192, %cst_57 [1, 2] : vector<1x1x128xf32> to vector<1xf32>
      %194 = vector.shape_cast %193 : vector<1xf32> to vector<1x1x1xf32>
      %195 = vector.extract %194[0, 0, 0] : f32 from vector<1x1x1xf32>
      %c1_i32 = arith.constant 1 : i32
      %196 = vector.broadcast %c1_i32 : i32 to vector<1x8x128xi32>
      %197 = arith.cmpi eq, %54, %196 : vector<1x8x128xi32>
      %cst_58 = arith.constant 0.000000e+00 : f32
      %198 = vector.broadcast %104 : f32 to vector<1x8x128xf32>
      %199 = vector.broadcast %cst_58 : f32 to vector<1x8x128xf32>
      %200 = arith.select %197, %198, %199 : vector<1x8x128xi1>, vector<1x8x128xf32>
      %c2_i32 = arith.constant 2 : i32
      %201 = vector.broadcast %c2_i32 : i32 to vector<1x8x128xi32>
      %202 = arith.cmpi eq, %54, %201 : vector<1x8x128xi32>
      %cst_59 = arith.constant 0.000000e+00 : f32
      %203 = vector.broadcast %195 : f32 to vector<1x8x128xf32>
      %204 = vector.broadcast %cst_59 : f32 to vector<1x8x128xf32>
      %205 = arith.select %202, %203, %204 : vector<1x8x128xi1>, vector<1x8x128xf32>
      %206 = arith.addf %200, %205 : vector<1x8x128xf32>
      %c3_i32 = arith.constant 3 : i32
      %207 = vector.broadcast %c3_i32 : i32 to vector<1x8x128xi32>
      %208 = arith.cmpi eq, %54, %207 : vector<1x8x128xi32>
      %cst_60 = arith.constant 0.000000e+00 : f32
      %209 = vector.broadcast %109 : f32 to vector<1x8x128xf32>
      %210 = vector.broadcast %cst_60 : f32 to vector<1x8x128xf32>
      %211 = arith.select %208, %209, %210 : vector<1x8x128xi1>, vector<1x8x128xf32>
      %212 = arith.addf %206, %211 : vector<1x8x128xf32>
      %c4_i32 = arith.constant 4 : i32
      %213 = vector.broadcast %c4_i32 : i32 to vector<1x8x128xi32>
      %214 = arith.cmpi eq, %54, %213 : vector<1x8x128xi32>
      %cst_61 = arith.constant 0.000000e+00 : f32
      %215 = vector.broadcast %114 : f32 to vector<1x8x128xf32>
      %216 = vector.broadcast %cst_61 : f32 to vector<1x8x128xf32>
      %217 = arith.select %214, %215, %216 : vector<1x8x128xi1>, vector<1x8x128xf32>
      %218 = arith.addf %212, %217 : vector<1x8x128xf32>
      %c0_62 = arith.constant 0 : index
      %c0_63 = arith.constant 0 : index
      %c0_64 = arith.constant 0 : index
      %219 = vector.load %arg7[%c0_62, %c0_63, %c0_64] : memref<1x8x128xf32, #tpu.memory_space<vmem>>, vector<1x8x128xf32>
      %220 = arith.addf %219, %218 : vector<1x8x128xf32>
      %c0_65 = arith.constant 0 : index
      %c0_66 = arith.constant 0 : index
      %c0_67 = arith.constant 0 : index
      %221 = vector.load %arg7[%c0_65, %c0_66, %c0_67] : memref<1x8x128xf32, #tpu.memory_space<vmem>>, vector<1x8x128xf32>
      tpu.vector_store %arg7[%c0_65, %c0_66, %c0_67], %220 {strides = array<i32>} : memref<1x8x128xf32, #tpu.memory_space<vmem>>, vector<1x8x128xf32>,
    } else {
    }
    return
  }
  func.func @transform_0(%arg0: i32, %arg1: memref<1xi32, #tpu.memory_space<smem>>) -> (i32, i32, i32) {
    %c0_i32 = arith.constant 0 : i32
    %c0_i32_0 = arith.constant 0 : i32
    %c0_i32_1 = arith.constant 0 : i32
    return %c0_i32, %arg0, %c0_i32_0 : i32, i32, i32
  }
  func.func @transform_1(%arg0: i32, %arg1: memref<1xi32, #tpu.memory_space<smem>>) -> (i32, i32, i32) {
    %c0_i32 = arith.constant 0 : i32
    %c0_i32_0 = arith.constant 0 : i32
    %c0_i32_1 = arith.constant 0 : i32
    return %c0_i32, %arg0, %c0_i32_0 : i32, i32, i32
  }
  func.func @transform_2(%arg0: i32, %arg1: memref<1xi32, #tpu.memory_space<smem>>) -> (i32, i32, i32) {
    %c0_i32 = arith.constant 0 : i32
    %c0_i32_0 = arith.constant 0 : i32
    %c0_i32_1 = arith.constant 0 : i32
    %c0_i32_2 = arith.constant 0 : i32
    return %c0_i32, %c0_i32_0, %c0_i32_1 : i32, i32, i32
  }
  func.func @transform_3(%arg0: i32, %arg1: memref<1xi32, #tpu.memory_space<smem>>) -> (i32, i32) {
    %c0_i32 = arith.constant 0 : i32
    %c0_i32_0 = arith.constant 0 : i32
    %c0_i32_1 = arith.constant 0 : i32
    return %c0_i32, %c0_i32_0 : i32, i32
  }
  func.func @transform_4(%arg0: i32, %arg1: memref<1xi32, #tpu.memory_space<smem>>) -> (i32, i32) {
    %c0_i32 = arith.constant 0 : i32
    %c0_i32_0 = arith.constant 0 : i32
    %c0_i32_1 = arith.constant 0 : i32
    return %c0_i32, %c0_i32_0 : i32, i32
  }
  func.func @transform_5(%arg0: i32, %arg1: memref<1xi32, #tpu.memory_space<smem>>) -> (i32, i32, i32) {
    %c0_i32 = arith.constant 0 : i32
    %c0_i32_0 = arith.constant 0 : i32
    %c0_i32_1 = arith.constant 0 : i32
    return %arg0, %c0_i32, %c0_i32_0 : i32, i32, i32
  }
}

</mosaic_0001>

<bundles_post_ra>
// kernel: tpu_custom_call.1
= control target key start
LH: loop header
LB: loop body
LE: loop exit
PB: predicated region body
PF: predicated region fallthrough
CT: control target
= control target key end

     0   :  { %12 = vsyncpa [#allocation5], 0  ;;  %s1153_s0 = inlined_call_operand.<no memory space> [shape: s32[1], index: 0, kind: input, shape index: {}]   ;;  %s1154_s1 = inlined_call_operand.hbm [shape: f32[2,16,256], index: 1, kind: input, shape index: {}]   ;;  %s1155_s2 = inlined_call_operand.vmem [shape: f32[2,16,8], index: 2, kind: input, shape index: {}]   ;;  %s1156_s3 = inlined_call_operand.vmem [shape: f32[2,8,256], index: 3, kind: input, shape index: {}]   ;;  %s1157_s4 = inlined_call_operand.vmem [shape: s8[2,256], index: 4, kind: input, shape index: {}]   ;;  %s1158_s5 = inlined_call_operand.vmem [shape: f32[8,128], index: 5, kind: input, shape index: {}]   ;;  %s1159_s6 = inlined_call_operand.hbm [shape: f32[1,8,128], index: 6, kind: output, shape index: {}]  }
   0x1   :  { %13 = vsyncpa [#allocation6], 0  ;;  %s837_s21 = smov [#allocation4]  }
   0x2   :  { %s19_s22 = sshll.u32 %s837_s21, 4  ;;  %s20_s22 = int_to_ptr.vmem [resolvable:$true] %s19_s22 }
   0x3   :  { %s801_s23 = scalar_lea.vmem %s20_s22, 1024  ;;  %p806_p1 = scmp.lt.s32.totalorder %s20_s22, %s20_s22 }
   0x4   :  { %p802_p0 = scmp.ne.s32.totalorder %s20_s22, %s801_s23  ;;  %p807_p2 = scmp.lt.s32.totalorder %s801_s23, %s801_s23 }
   0x6   :  { %p808_p3 = por %p807_p2, %p806_p1 }
   0x8   :  { %p809_p4 = pnand %p808_p3, %p802_p0 }
   0xa   :  { %812 = shalt.err (!%p809_p4)
}
   0xb   :  { %s838_s24 = smov 256   ;;  %s839_s25 = smov 16  }
   0xc   :  { %25 = dma.hbm_to_vmem [thread:$0]  %s1154_s1, 1024, %s20_s22, [#allocation5], %s838_s24, %s838_s24, %s839_s25  }
   0xd   :  { %833 = dma.done.wait [#allocation5], 1024  }
   0xe   :  { %834 = vsyncadd [#allocation5], 4294966272  ;;  %v463_v0 = vlaneseq  ;;  %v840_v1 = vmov 0.0   ;;  %v888_v4 = vld [vmem:[#allocation4 + $0x20] sm:$0xff]  ;;  %v890_v5 = vld [vmem:[#allocation4 + $0x28] sm:$0xff]  ;;  %vm53_vm1 = vcmask 64512   ;;  %v563_v38 = vstv %s1153_s0 }
   0xf   :  { %207 = vmatprep.mubr.f32.mxu1 %v840_v1  ;;  %124 = vmatprep.mubr.f32.mxu0 %v840_v1  ;;  %v892_v6 = vld [vmem:[#allocation4] sm:$0xff]  ;;  %v896_v8 = vld [vmem:[#allocation4 + $0x8] sm:$0xff]  ;;  %v901_v11 = vld [vmem:[#allocation4 + $0x30] sm:$0xff]  ;;  %s841_s0 = smov 1   ;;  %vm450_vm8 = vcmask 1041408   ;;  %vm328_vm9 = vcmp.ge.f32.partialorder %v888_v4, 0.0 }
  0x10   :  { %v885_v2 = vand.u32 127, %v463_v0  ;;  %v904_v13 = vld [vmem:[#allocation4 + $0x38] sm:$0xff]  ;;  %v906_v14 = vld [vmem:[#allocation4 + $0x10] sm:$0xff]  ;;  %v50_v22 = vld [vmem:[%s1156_s3 + $0x8] sm:$0xff]  ;;  %vm324_vm10 = vcmp.ge.f32.partialorder %v892_v6, 0.0  ;;  %vm329_vm11 = vcmp.ge.f32.partialorder %v890_v5, 0.0 }
  0x11   :  { %v910_v16 = vld [vmem:[#allocation4 + $0x18] sm:$0xff]  ;;  %v51_v20 = vld [vmem:[%s1156_s3 + $0x10] sm:$0xff]  ;;  %v49_v24 = vld [vmem:[%s1156_s3] sm:$0xff]  ;;  %90 = vmatprep.subr.mxu0 %v50_v22  ;;  %vm330_vm12 = vcmp.ge.f32.partialorder %v901_v11, 0.0  ;;  %vm325_vm13 = vcmp.ge.f32.partialorder %v896_v8, 0.0  ;;  %vm326_vm15 = vcmp.ge.f32.partialorder %v906_v14, 0.0 }
  0x12   :  { %v465_v3 = vadd.s32 128, %v885_v2  ;;  %v52_v19 = vld [vmem:[%s1156_s3 + $0x18] sm:$0xff]  ;;  %v47_v23 = vld [vmem:[%s1155_s2 + $0x10] sm:$0xff]  ;;  %v45_v25 = vld [vmem:[%s1155_s2] sm:$0xff]  ;;  %91 = vmatpush1.msra.mxu0 %v49_v24  ;;  %vm564_vm2 = vcmp.lt.s32.totalorder %v885_v2, %v563_v38  ;;  %s844_s1 = smov [#allocation7]  }
  0x13   :  { %173 = vmatprep.subr.mxu1 %v52_v19  ;;  %v48_v26 = vld [vmem:[%s1155_s2 + $0x18] sm:$0xff]  ;;  %700 = vmatmul.mubr.msk.f32.vlgmr.msra.gmra.mxu0 %vm53_vm1, %v45_v25  ;;  %v46_v27 = vld [vmem:[%s1155_s2 + $0x8] sm:$0xff]  ;;  %v949_v28 = vld [vmem:[%s1158_s5] sm:$0xff]  ;;  %v959_v46 = vsel %vm564_vm2, 1.0, %v840_v1  ;;  %v232_v19 = vand.u32 2147483647, %v888_v4 }
  0x14   :  { %vm467_vm0 = vcmp.eq.s32.totalorder %v465_v3, 255  ;;  %174 = vmatpush1.msra.mxu1 %v51_v20  ;;  %130 = vmatprep.mubr.f32.mxu0 %v840_v1  ;;  %v607_v29 = vmul.f32 0.5, %v949_v28  ;;  %vm645_vm3 = vcmp.gt.f32.partialorder %v959_v46, 0.0  ;;  %v229_v25 = vand.u32 2147483647, %v896_v8  ;;  %s691_s28 = sshll.u32 %s844_s1, 4  ;;  %s692_s28 = int_to_ptr.vmem [resolvable:$true] %s691_s28 }
  0x15   :  { %v477_v7 = vsel %vm467_vm0, -inf, %v890_v5  ;;  %v473_v10 = vsel %vm467_vm0, -inf, %v896_v8  ;;  %v479_v15 = vsel %vm467_vm0, -inf, %v904_v13  ;;  %v475_v18 = vsel %vm467_vm0, -inf, %v910_v16  ;;  %702 = vmatmul.mubr.msk.f32.vlgmr.msra.gmra.mxu1 %vm53_vm1, %v47_v23  ;;  %s813_s29 = scalar_lea.vmem %s692_s28, 128  ;;  %p818_p6 = scmp.lt.s32.totalorder %s692_s28, %s692_s28 }
  0x16   :  { %v486_v9 = vmax.f32 %v888_v4, %v477_v7  ;;  %v480_v12 = vmax.f32 %v892_v6, %v473_v10  ;;  %v489_v17 = vmax.f32 %v901_v11, %v479_v15  ;;  %v483_v21 = vmax.f32 %v906_v14, %v475_v18  ;;  %213 = vmatprep.mubr.f32.mxu1 %v840_v1  ;;  %p814_p5 = scmp.ne.s32.totalorder %s692_s28, %s813_s29  ;;  %p819_p7 = scmp.lt.s32.totalorder %s813_s29, %s813_s29 }
  0x17   :  { %701 = vmatmul.mubr.msk.f32.gmra.mxu0 %vm53_vm1, %v46_v27  ;;  %v609_v30 = vrot.slane %v607_v29, 2  ;;  %v233_v23 = vand.u32 2147483647, %v890_v5  ;;  %v240_v24 = vsub.f32 0.0, %v232_v19  ;;  %v230_v27 = vand.u32 2147483647, %v906_v14 }
  0x18   :  { %487 = vmax.xlane.f32.xlu1 %v486_v9  ;;  %481 = vmax.xlane.f32.xlu0 %v480_v12  ;;  %p820_p8 = por %p819_p7, %p818_p6 }
  0x19   :  { %703 = vmatmul.mubr.msk.f32.gmra.mxu1 %vm53_vm1, %v48_v26  ;;  %v611_v31 = vsub.f32 %v949_v28, %v609_v30  ;;  %v612_v32 = vadd.f32 %v609_v30, %v949_v28  ;;  %v241_v29 = vsub.f32 0.0, %v233_v23  ;;  %v235_v30 = vand.u32 2147483647, %v904_v13 }
  0x1a   :  { %v274_v23 = vmax.f32 %v901_v11, 0.0  ;;  %vm842_vm1 = vmmov 1   ;;  %p821_p9 = pnand %p820_p8, %p814_p5 }
  0x1b   :  { %v619_v33 = vrot.slane %v612_v32, 4  ;;  %v623_v34 = vrot.slane %v611_v31, 4  ;;  %v613_v35 = vsub.f32 %v612_v32, %v611_v31  ;;  %v243_v38 = vsub.f32 0.0, %v235_v30 }
  0x1c   :  { %490 = vmax.xlane.f32.xlu1 %v489_v17  ;;  %484 = vmax.xlane.f32.xlu0 %v483_v21  ;;  %v228_v21 = vand.u32 2147483647, %v892_v6 }
  0x1d   :  { %v621_v36 = vmin.f32 %v612_v32, %v619_v33  ;;  %v625_v37 = vmax.f32 %v611_v31, %v623_v34  ;;  %v637_v39 = vmax.f32 %v612_v32, %v619_v33  ;;  %v638_v40 = vmin.f32 %v611_v31, %v623_v34 }
  0x1e   :  { %v615_v41 = vrot.slane %v613_v35, 1  ;;  %v236_v26 = vsub.f32 0.0, %v228_v21  ;;  %v252_v31 = vmul.f32 1.442695, %v240_v24  ;;  %v237_v32 = vsub.f32 0.0, %v229_v25 }
  0x1f   :  { %v626_v42 = vsub.f32 %v621_v36, %v625_v37  ;;  %v639_v43 = vsub.f32 %v637_v39, %v638_v40  ;;  %v231_v36 = vand.u32 2147483647, %v910_v16  ;;  %v254_v37 = vmul.f32 1.442695, %v241_v29 }
  0x20   :  { %v617_v44 = vmul.f32 %v615_v41, %v613_v35  ;;  %v244_v34 = vmul.f32 1.442695, %v236_v26  ;;  %v238_v35 = vsub.f32 0.0, %v230_v27  ;;  %v246_v39 = vmul.f32 1.442695, %v237_v32 }
  0x21   :  { %v627_v45 = vmax.f32 %v626_v42, 0.0  ;;  %v640_v47 = vmax.f32 %v639_v43, 0.0  ;;  %v568_v40 = vrot.slane %v949_v28, 4  ;;  %v239_v43 = vsub.f32 0.0, %v231_v36 }
  0x22   :  { %v633_v49 = vrot.slane %v617_v44, 4  ;;  %v248_v42 = vmul.f32 1.442695, %v238_v35  ;;  %v269_v21 = vmax.f32 %v896_v8, 0.0  ;;  %v270_v25 = vmax.f32 %v906_v14, 0.0 }
  0x23   :  { %v629_v48 = vrot.slane %v627_v45, 1  ;;  %v642_v50 = vrot.slane %v640_v47, 1  ;;  %v271_v32 = vmax.f32 %v910_v16, 0.0 }
  0x24   :  { %v635_v52 = vadd.f32 %v633_v49, %v617_v44  ;;  %v258_v44 = vmul.f32 1.442695, %v243_v38 }
  0x25   :  { %v631_v51 = vmul.f32 %v629_v48, %v627_v45  ;;  %v644_v53 = vmul.f32 %v642_v50, %v640_v47  ;;  %v570_v45 = vsub.f32 %v949_v28, %v568_v40  ;;  %v250_v47 = vmul.f32 1.442695, %v239_v43 }
  0x27   :  { %v636_v54 = vsub.f32 %v635_v52, %v631_v51  ;;  %v647_v55 = vsel %vm645_vm3, %v644_v53, 1.0  ;;  %v571_v48 = vand.u32 2147483647, %v570_v45 }
  0x28   :  { %741 = vrcp.f32 %v647_v55 }
  0x29   :  { %v646_v56 = vsel %vm645_vm3, %v636_v54, 1.0  ;;  %v650_v59 = vsub.f32 %v644_v53, %v636_v54  ;;  %v984_v49 = vmul.f32 %v959_v46, %v571_v48 }
  0x2a   :  { %743 = vrcp.f32 %v646_v56 }
  0x2b   :  { %745 = vpow2.f32 %v252_v31  ;;  %v584_v28 = vsel %vm450_vm8, %v984_v49, 0.0 }
  0x2c   :  { %747 = vpow2.f32 %v244_v34 }
  0x2d   :  { %749 = vpow2.f32 %v254_v37 }
  0x2e   :  { %751 = vpow2.f32 %v246_v39 }
  0x35   :  { %v742_v60 = vpop.eup %741 }
  0x36   :  { %v652_v3 = vmul.f32 %v742_v60, %v650_v59 }
  0x37   :  { %v744_v63 = vpop.eup %743 }
  0x38   :  { %v649_v9 = vmul.f32 %v744_v63, %v631_v51  ;;  %v986_v50 = vpop.eup %745 }
  0x39   :  { %v988_v51 = vpop.eup %747  ;;  %v264_v53 = vadd.f32 1.0, %v986_v50 }
  0x3a   :  { %v653_v18 = vsub.f32 %v649_v9, %v652_v3  ;;  %v990_v52 = vpop.eup %749  ;;  %v260_v56 = vadd.f32 1.0, %v988_v51  ;;  %v272_v9 = vmax.f32 %v888_v4, 0.0 }
  0x3b   :  { %v995_v54 = vpop.eup %751 }
  0x3c   :  { %v654_v20 = vsub.f32 1.0, %v653_v18  ;;  %v261_v59 = vadd.f32 1.0, %v995_v54 }
  0x3e   :  { %v973_v22 = vmul.f32 %v959_v46, %v654_v20 }
  0xa1   :  { %v488_v57 = vpop.xlane.xlu1 %487  ;;  %v482_v58 = vpop.xlane.xlu0 %481 }
  0xa2   :  { %vm494_vm4 = vcmp.ge.f32.partialorder %v488_v57, %v890_v5  ;;  %vm492_vm5 = vcmp.ge.f32.partialorder %v482_v58, %v896_v8  ;;  %v265_v57 = vadd.f32 1.0, %v990_v52 }
  0xa3   :  { %v706_v61 = vsel %vm494_vm4, 1.0, %v840_v1  ;;  %v704_v10 = vsel %vm492_vm5, 1.0, %v840_v1 }
  0xa5   :  { %v491_v62 = vpop.xlane.xlu1 %490  ;;  %v485_v0 = vpop.xlane.xlu0 %484 }
  0xa6   :  { %vm495_vm6 = vcmp.ge.f32.partialorder %v491_v62, %v904_v13  ;;  %vm493_vm7 = vcmp.ge.f32.partialorder %v485_v0, %v910_v16 }
  0xa7   :  { %v707_v7 = vsel %vm495_vm6, 1.0, %v840_v1  ;;  %v705_v15 = vsel %vm493_vm7, 1.0, %v840_v1  ;;  %v234_v1 = vand.u32 2147483647, %v901_v11  ;;  %vm331_vm6 = vcmp.ge.f32.partialorder %v904_v13, 0.0 }
  0xa8   :  { %v736_v12 = vpack.i.bf16 %v707_v7, %v706_v61  ;;  %v731_v17 = vpack.i.bf16 %v705_v15, %v704_v10 }
  0xa9   :  { %v242_v33 = vsub.f32 0.0, %v234_v1  ;;  %v275_v1 = vmax.f32 %v904_v13, 0.0 }
  0xaa   :  { %737 = vrot.lane.b32.xlu1 %v736_v12, %s841_s0  ;;  %732 = vrot.lane.b32.xlu0 %v731_v17, %s841_s0  ;;  %v268_v12 = vmax.f32 %v892_v6, 0.0  ;;  %v273_v17 = vmax.f32 %v890_v5, 0.0 }
  0xab   :  { %v256_v41 = vmul.f32 1.442695, %v242_v33 }
  0xad   :  { %753 = vpow2.f32 %v256_v41 }
  0xae   :  { %755 = vpow2.f32 %v248_v42 }
  0xaf   :  { %757 = vpow2.f32 %v258_v44 }
  0xb0   :  { %759 = vpow2.f32 %v250_v47 }
  0xb1   :  { %761 = vlog2.f32 %v264_v53 }
  0xb2   :  { %763 = vrcp.f32 %v264_v53 }
  0xb3   :  { %765 = vlog2.f32 %v260_v56 }
  0xb4   :  { %767 = vlog2.f32 %v265_v57 }
  0xb5   :  { %769 = vlog2.f32 %v261_v59 }
  0xba   :  { %v997_v55 = vpop.eup %753 }
  0xbb   :  { %v1000_v46 = vpop.eup %755  ;;  %v266_v60 = vadd.f32 1.0, %v997_v55 }
  0xbc   :  { %v1003_v58 = vpop.eup %757  ;;  %v262_v61 = vadd.f32 1.0, %v1000_v46 }
  0xbd   :  { %v1008_v62 = vpop.eup %759  ;;  %v267_v63 = vadd.f32 1.0, %v1003_v58  ;;  %771 = vlog2.f32 %v266_v60 }
  0xbe   :  { %773 = vlog2.f32 %v262_v61  ;;  %v263_v0 = vadd.f32 1.0, %v1008_v62  ;;  %v762_v3 = vpop.eup %761 }
  0xbf   :  { %775 = vlog2.f32 %v267_v63  ;;  %v764_v7 = vpop.eup %763  ;;  %v301_v20 = vmul.f32 0.6931472, %v762_v3  ;;  %v843_v3 = vmov 0.75  }
  0xc0   :  { %777 = vrcp.f32 %v260_v56  ;;  %v766_v10 = vpop.eup %765 }
  0xc1   :  { %779 = vlog2.f32 %v263_v0  ;;  %v768_v15 = vpop.eup %767  ;;  %v293_v30 = vmul.f32 0.6931472, %v766_v10 }
  0xc2   :  { %781 = vrcp.f32 %v265_v57  ;;  %v770_v18 = vpop.eup %769  ;;  %v303_v35 = vmul.f32 0.6931472, %v768_v15 }
  0xc3   :  { %783 = vrcp.f32 %v261_v59  ;;  %v1040_v39 = vmul.f32 0.6931472, %v770_v18 }
  0xc4   :  { %785 = vrcp.f32 %v266_v60 }
  0xc5   :  { %787 = vrcp.f32 %v262_v61 }
  0xc6   :  { %789 = vrcp.f32 %v267_v63 }
  0xc7   :  { %791 = vrcp.f32 %v263_v0 }
  0xc9   :  { %585 = vadd.xlane.f32.xlu0 %v584_v28 }
  0xca   :  { %v772_v24 = vpop.eup %771 }
  0xcb   :  { %v774_v26 = vpop.eup %773  ;;  %v305_v44 = vmul.f32 0.6931472, %v772_v24 }
  0xcc   :  { %v776_v33 = vpop.eup %775  ;;  %v297_v48 = vmul.f32 0.6931472, %v774_v26 }
  0xcd   :  { %v778_v36 = vpop.eup %777 }
  0xce   :  { %v780_v45 = vpop.eup %779 }
  0xcf   :  { %v782_v53 = vpop.eup %781 }
  0xd0   :  { %v784_v63 = vpop.eup %783 }
  0xd1   :  { %v786_v15 = vpop.eup %785 }
  0xd3   :  { %v126_v29 = vpop.f32.mrf.mxu0 }
  0xd4   :  { %vm220_vm3 = vcmp.gt.f32.partialorder %v126_v29, 0.5 }
  0xd5   :  { %v209_v19 = vpop.f32.mrf.mxu1  ;;  %vm332_vm5 = vmxor %vm220_vm3, %vm324_vm10  ;;  %v1044_v43 = vpop.f32.mrf.mxu0 }
  0xd6   :  { %vm224_vm14 = vcmp.gt.f32.partialorder %v209_v19, 0.5  ;;  %vm340_vm7 = vmxor %vm332_vm5, %vm842_vm1  ;;  %vm221_vm10 = vcmp.gt.f32.partialorder %v1044_v43, 0.5  ;;  %v380_v19 = vsel %vm220_vm3, 0.25, %v843_v3 }
  0xd7   :  { %v280_v27 = vsel %vm224_vm14, %v888_v4, 0.0  ;;  %vm336_vm0 = vmxor %vm224_vm14, %vm328_vm9  ;;  %v211_v31 = vpop.f32.mrf.mxu1  ;;  %v276_v4 = vsel %vm220_vm3, %v892_v6, 0.0  ;;  %v348_v6 = vsel %vm340_vm7, %v988_v51, 1.0  ;;  %v277_v60 = vsel %vm221_vm10, %v896_v8, 0.0  ;;  %v132_v10 = vpop.f32.mrf.mxu0 }
  0xd8   :  { %v288_v34 = vsub.f32 %v272_v9, %v280_v27  ;;  %vm344_vm2 = vmxor %vm336_vm0, %vm842_vm1  ;;  %vm225_vm4 = vcmp.gt.f32.partialorder %v211_v31, 0.5  ;;  %v284_v42 = vsub.f32 %v268_v12, %v276_v4  ;;  %vm327_vm0 = vcmp.ge.f32.partialorder %v910_v16, 0.0 }
  0xd9   :  { %v352_v37 = vsel %vm344_vm2, %v986_v50, 1.0  ;;  %v281_v38 = vsel %vm225_vm4, %v890_v5, 0.0  ;;  %vm337_vm9 = vmxor %vm225_vm4, %vm329_vm11  ;;  %v215_v47 = vpop.f32.mrf.mxu1  ;;  %v1051_v50 = vmul.f32 0.6931472, %v776_v33  ;;  %v356_v56 = vmul.f32 %v778_v36, %v348_v6 }
  0xda   :  { %v312_v40 = vadd.f32 %v301_v20, %v288_v34  ;;  %v360_v41 = vmul.f32 %v764_v7, %v352_v37  ;;  %v289_v57 = vsub.f32 %v273_v17, %v281_v38  ;;  %vm1055_vm2 = vmxor %vm337_vm9, %vm842_vm1  ;;  %vm226_vm5 = vcmp.gt.f32.partialorder %v215_v47, 0.5 }
  0xdb   :  { %v308_v5 = vadd.f32 %v293_v30, %v284_v42  ;;  %v353_v51 = vsel %vm1055_vm2, %v990_v52, 1.0  ;;  %vm333_vm11 = vmxor %vm221_vm10, %vm325_vm13  ;;  %v282_v61 = vsel %vm226_vm5, %v901_v11, 0.0  ;;  %v384_v7 = vsel %vm224_vm14, 0.25, %v843_v3  ;;  %v788_v30 = vpop.eup %787 }
  0xdc   :  { %v368_v28 = vmul.f32 %v360_v41, %v360_v41  ;;  %v364_v9 = vmul.f32 %v356_v56, %v356_v56  ;;  %vm1074_vm7 = vmxor %vm333_vm11, %vm842_vm1  ;;  %v299_v12 = vmul.f32 0.6931472, %v780_v45  ;;  %v361_v17 = vmul.f32 %v782_v53, %v353_v51  ;;  %v790_v36 = vpop.eup %789 }
  0xdd   :  { %v349_v18 = vsel %vm1074_vm7, %v995_v54, 1.0  ;;  %v290_v20 = vsub.f32 %v274_v23, %v282_v61  ;;  %vm338_vm13 = vmxor %vm226_vm5, %vm330_vm12  ;;  %vm222_vm14 = vcmp.gt.f32.partialorder %v132_v10, 0.5  ;;  %v313_v24 = vadd.f32 %v303_v35, %v289_v57  ;;  %v217_v54 = vpop.f32.mrf.mxu1  ;;  %v134_v35 = vpop.f32.mrf.mxu0 }
  0xde   :  { %v376_v0 = vmul.f32 %v368_v28, %v312_v40  ;;  %v385_v26 = vsel %vm225_vm4, 0.25, %v843_v3  ;;  %v285_v27 = vsub.f32 %v269_v21, %v277_v60  ;;  %vm346_vm9 = vmxor %vm338_vm13, %vm842_vm1  ;;  %v372_v23 = vmul.f32 %v364_v9, %v308_v5  ;;  %v792_v38 = vpop.eup %791  ;;  %v396_v9 = vld [vmem:[%s1157_s4] sm:$0x3] }
  0xdf   :  { %v357_v33 = vmul.f32 %v784_v63, %v349_v18  ;;  %v354_v11 = vsel %vm346_vm9, %v997_v55, 1.0  ;;  %v278_v34 = vsel %vm222_vm14, %v906_v14, 0.0  ;;  %vm334_vm12 = vmxor %vm222_vm14, %vm326_vm15  ;;  %v314_v29 = vadd.f32 %v305_v44, %v290_v20 }
  0xe0   :  { %v362_v31 = vmul.f32 %v786_v15, %v354_v11  ;;  %v386_v8 = vsel %vm226_vm5, 0.25, %v843_v3  ;;  %v286_v21 = vsub.f32 %v270_v25, %v278_v34  ;;  %vm342_vm3 = vmxor %vm334_vm12, %vm842_vm1  ;;  %v392_v55 = vmul.f32 %v384_v7, %v376_v0 }
  0xe1   :  { %v369_v37 = vmul.f32 %v361_v17, %v361_v17  ;;  %v350_v4 = vsel %vm342_vm3, %v1000_v46, 1.0  ;;  %vm227_vm4 = vcmp.gt.f32.partialorder %v217_v54, 0.5  ;;  %v309_v40 = vadd.f32 %v1040_v39, %v285_v27 }
  0xe2   :  { %v370_v41 = vmul.f32 %v362_v31, %v362_v31  ;;  %v310_v42 = vadd.f32 %v297_v48, %v286_v21  ;;  %v358_v44 = vmul.f32 %v788_v30, %v350_v4  ;;  %vm339_vm15 = vmxor %vm227_vm4, %vm331_vm6  ;;  %v388_v14 = vmul.f32 %v380_v19, %v372_v23 }
  0xe3   :  { %v365_v25 = vmul.f32 %v357_v33, %v357_v33  ;;  %v283_v45 = vsel %vm227_vm4, %v904_v13, 0.0  ;;  %vm347_vm2 = vmxor %vm339_vm15, %vm842_vm1  ;;  %vm223_vm5 = vcmp.gt.f32.partialorder %v134_v35, 0.5  ;;  %v377_v48 = vmul.f32 %v369_v37, %v313_v24 }
  0xe4   :  { %v378_v46 = vmul.f32 %v370_v41, %v314_v29  ;;  %v366_v6 = vmul.f32 %v358_v44, %v358_v44  ;;  %v291_v39 = vsub.f32 %v275_v1, %v283_v45  ;;  %v355_v47 = vsel %vm347_vm2, %v1003_v58, 1.0  ;;  %vm335_vm11 = vmxor %vm223_vm5, %vm327_vm0 }
  0xe5   :  { %v382_v53 = vsel %vm222_vm14, 0.25, %v843_v3  ;;  %v363_v28 = vmul.f32 %v790_v36, %v355_v47  ;;  %v279_v56 = vsel %vm223_vm5, %v910_v16, 0.0  ;;  %vm343_vm6 = vmxor %vm335_vm11, %vm842_vm1  ;;  %v373_v1 = vmul.f32 %v365_v25, %v309_v40 }
  0xe6   :  { %v394_v57 = vmul.f32 %v386_v8, %v378_v46  ;;  %v374_v59 = vmul.f32 %v366_v6, %v310_v42  ;;  %v315_v13 = vadd.f32 %v1051_v50, %v291_v39  ;;  %v287_v58 = vsub.f32 %v271_v32, %v279_v56 }
  0xe7   :  { %v371_v5 = vmul.f32 %v363_v28, %v363_v28  ;;  %v387_v51 = vsel %vm227_vm4, 0.25, %v843_v3  ;;  %v351_v60 = vsel %vm343_vm6, %v1008_v62, 1.0  ;;  %v393_v52 = vmul.f32 %v385_v26, %v377_v48 }
  0xe8   :  { %v413_v61 = vadd.f32 %v394_v57, %v392_v55  ;;  %v390_v63 = vmul.f32 %v382_v53, %v374_v59  ;;  %v311_v0 = vadd.f32 %v299_v12, %v287_v58  ;;  %v359_v7 = vmul.f32 %v792_v38, %v351_v60 }
  0xe9   :  { %v381_v16 = vsel %vm221_vm10, 0.25, %v843_v3  ;;  %v379_v32 = vmul.f32 %v371_v5, %v315_v13  ;;  %v383_v62 = vsel %vm223_vm5, 0.25, %v843_v3  ;;  %v397_v18 = vunpack.c.0.s8 %v396_v9 }
  0xea   :  { %v414_v50 = vrot.slane %v413_v61, 4  ;;  %v399_v10 = vadd.f32 %v390_v63, %v388_v14  ;;  %v367_v15 = vmul.f32 %v359_v7, %v359_v7  ;;  %v389_v12 = vmul.f32 %v381_v16, %v373_v1 }
  0xeb   :  { %v395_v17 = vmul.f32 %v387_v51, %v379_v32  ;;  %v398_v43 = vcvt.s32.f32 %v397_v18  ;;  %vm444_vm1 = vcmask 1041409   ;;  %vm573_vm10 = vcmask 1043456  }
  0xec   :  { %v415_v20 = vadd.f32 %v414_v50, %v413_v61  ;;  %v400_v19 = vrot.slane %v399_v10, 4  ;;  %v375_v24 = vmul.f32 %v367_v15, %v311_v0  ;;  %v574_v1 = vsel %vm573_vm10, %v984_v49, 0.0 }
  0xed   :  { %v420_v27 = vadd.f32 %v395_v17, %v393_v52  ;;  %v429_v35 = vrot.slane %v398_v43, 1  ;;  %v428_v36 = vcombine.high %v398_v43, %v398_v43  ;;  %v595_v5 = vrot.slane %v984_v49, 2 }
  0xee   :  { %v416_v54 = vrot.slane %v415_v20, 2  ;;  %v401_v26 = vadd.f32 %v400_v19, %v399_v10  ;;  %v391_v30 = vmul.f32 %v383_v62, %v375_v24  ;;  %vm516_vm0 = vcmask 7168  }
  0xef   :  { %v421_v23 = vrot.slane %v420_v27, 4  ;;  %v430_v14 = vrot.slane %v428_v36, 1  ;;  %v597_v51 = vsel %vm450_vm8, %v595_v5, 0.0  ;;  %vm656_vm7 = vcmask 1040384  }
  0xf0   :  { %v417_v33 = vadd.f32 %v416_v54, %v415_v20  ;;  %v402_v11 = vrot.slane %v401_v26, 2  ;;  %v406_v34 = vadd.f32 %v391_v30, %v389_v12  ;;  %v657_v49 = vsel %vm656_vm7, %v973_v22, 0.0 }
  0xf1   :  { %v422_v29 = vadd.f32 %v421_v23, %v420_v27  ;;  %vm667_vm13 = vcmp.eq.s32.totalorder %v885_v2, 1  ;;  %vm670_vm14 = vcmp.eq.s32.totalorder %v885_v2, 2  ;;  %vm504_vm9 = vcmp.eq.s32.totalorder %v885_v2, 0 }
  0xf2   :  { %v418_v31 = vrot.slane %v417_v33, 1  ;;  %v403_v8 = vadd.f32 %v402_v11, %v401_v26  ;;  %v407_v21 = vrot.slane %v406_v34, 4  ;;  %vm532_vm12 = vcmp.eq.s32.totalorder %v885_v2, 9 }
  0xf3   :  { %v423_v3 = vrot.slane %v422_v29, 2  ;;  %vm674_vm3 = vcmp.eq.s32.totalorder %v885_v2, 3  ;;  %vm678_vm4 = vcmp.eq.s32.totalorder %v885_v2, 4 }
  0xf4   :  { %v404_v55 = vrot.slane %v403_v8, 1  ;;  %v408_v37 = vadd.f32 %v407_v21, %v406_v34  ;;  %v419_v4 = vadd.f32 %v418_v31, %v417_v33 }
  0xf5   :  { %v424_v38 = vadd.f32 %v423_v3, %v422_v29 }
  0xf6   :  { %v409_v40 = vrot.slane %v408_v37, 2  ;;  %v405_v41 = vadd.f32 %v404_v55, %v403_v8  ;;  %v437_v42 = vmul.f32 %v429_v35, %v419_v4 }
  0xf7   :  { %v425_v44 = vrot.slane %v424_v38, 1 }
  0xf8   :  { %v410_v25 = vadd.f32 %v409_v40, %v408_v37  ;;  %v435_v45 = vmul.f32 %v405_v41, %v398_v43  ;;  %v443_v46 = vrot.slane %v437_v42, 7 }
  0xf9   :  { %v426_v6 = vadd.f32 %v425_v44, %v424_v38 }
  0xfa   :  { %v411_v39 = vrot.slane %v410_v25, 1  ;;  %v445_v53 = vsel %vm444_vm1, %v443_v46, %v435_v45 }
  0xfb   :  { %v438_v47 = vmul.f32 %v430_v14, %v426_v6  ;;  %v451_v57 = vsel %vm450_vm8, %v445_v53, 0.0 }
  0xfc   :  { %v412_v48 = vadd.f32 %v411_v39, %v410_v25 }
  0xfd   :  { %v446_v28 = vrot.slane %v438_v47, 7 }
  0xfe   :  { %v436_v56 = vmul.f32 %v428_v36, %v412_v48 }
 0x100   :  { %v447_v59 = vsel %vm444_vm1, %v446_v28, %v436_v56 }
 0x101   :  { %v452_v13 = vsel %vm450_vm8, %v447_v59, 0.0  ;;  %vm507_vm8 = vcmp.eq.s32.totalorder %v885_v2, 8 }
 0x102   :  { %v453_v58 = vadd.f32 %v452_v13, %v451_v57 }
 0x104   :  { %454 = vadd.xlane.f32.xlu1 %v453_v58 }
 0x108   :  { %575 = vadd.xlane.f32.xlu1 %v574_v1 }
 0x10c   :  { %598 = vadd.xlane.f32.xlu1 %v597_v51 }
 0x11c   :  { %v738_v60 = vpop.permute.xlu1 %737  ;;  %v733_v61 = vpop.permute.xlu0 %732 }
 0x11d   :  { %v740_v63 = vunpack.i.h.bf16 %v738_v60  ;;  %v739_v0 = vunpack.i.l.bf16 %v738_v60  ;;  %v735_v7 = vunpack.i.h.bf16 %v733_v61  ;;  %v734_v9 = vunpack.i.l.bf16 %v733_v61 }
 0x11f   :  { %v517_v52 = vsel %vm516_vm0, %v734_v9, 0.0  ;;  %v518_v16 = vsel %vm516_vm0, %v735_v7, 0.0  ;;  %v541_v50 = vsel %vm516_vm0, %v739_v0, 0.0  ;;  %v542_v10 = vsel %vm516_vm0, %v740_v63, 0.0 }
 0x120   :  { %v519_v32 = vadd.f32 %v518_v16, %v517_v52  ;;  %v543_v15 = vadd.f32 %v542_v10, %v541_v50 }
 0x122   :  { %520 = vadd.xlane.f32.xlu0 %v519_v32 }
 0x126   :  { %544 = vadd.xlane.f32.xlu0 %v543_v15 }
 0x12a   :  { %658 = vadd.xlane.f32.xlu0 %v657_v49 }
 0x152   :  { %v586_v54 = vpop.xlane.xlu0 %585 }
 0x153   :  { %v587_v23 = vrot.slane %v586_v54, 4 }
 0x155   :  { %v588_v34 = vadd.f32 %v587_v23, %v586_v54 }
 0x157   :  { %v589_v35 = vrot.slane %v588_v34, 2 }
 0x159   :  { %v590_v14 = vadd.f32 %v589_v35, %v588_v34 }
 0x15b   :  { %v591_v53 = vrot.slane %v590_v14, 1 }
 0x15d   :  { %v592_v13 = vadd.f32 %v591_v53, %v590_v14 }
 0x18d   :  { %v455_v17 = vpop.xlane.xlu1 %454 }
 0x18e   :  { %v456_v62 = vrot.slane %v455_v17, 4 }
 0x190   :  { %v457_v18 = vadd.f32 %v456_v62, %v455_v17 }
 0x191   :  { %v576_v27 = vpop.xlane.xlu1 %575 }
 0x192   :  { %v458_v12 = vrot.slane %v457_v18, 2  ;;  %v577_v30 = vrot.slane %v576_v27, 4 }
 0x194   :  { %v459_v20 = vadd.f32 %v458_v12, %v457_v18  ;;  %v578_v33 = vadd.f32 %v577_v30, %v576_v27 }
 0x195   :  { %v599_v26 = vpop.xlane.xlu1 %598 }
 0x196   :  { %v460_v19 = vrot.slane %v459_v20, 1  ;;  %v600_v43 = vrot.slane %v599_v26, 4  ;;  %v579_v8 = vrot.slane %v578_v33, 2 }
 0x198   :  { %v461_v24 = vadd.f32 %v460_v19, %v459_v20  ;;  %v601_v22 = vadd.f32 %v600_v43, %v599_v26  ;;  %v580_v40 = vadd.f32 %v579_v8, %v578_v33 }
 0x19a   :  { %709 = vpush %v461_v24  ;;  %v602_v55 = vrot.slane %v601_v22, 2  ;;  %v581_v39 = vrot.slane %v580_v40, 1 }
 0x19c   :  { %v603_v25 = vadd.f32 %v602_v55, %v601_v22  ;;  %v582_v59 = vadd.f32 %v581_v39, %v580_v40 }
 0x19e   :  { %v604_v28 = vrot.slane %v603_v25, 1 }
 0x1a0   :  { %v605_v1 = vadd.f32 %v604_v28, %v603_v25 }
 0x1ab   :  { %v521_v11 = vpop.xlane.xlu0 %520 }
 0x1ac   :  { %v522_v29 = vrot.slane %v521_v11, 4 }
 0x1ae   :  { %v523_v31 = vadd.f32 %v522_v29, %v521_v11 }
 0x1af   :  { %v545_v21 = vpop.xlane.xlu0 %544 }
 0x1b0   :  { %v524_v3 = vrot.slane %v523_v31, 2  ;;  %v546_v36 = vrot.slane %v545_v21, 4 }
 0x1b2   :  { %v547_v37 = vadd.f32 %v546_v36, %v545_v21  ;;  %v525_v4 = vadd.f32 %v524_v3, %v523_v31 }
 0x1b3   :  { %v659_v38 = vpop.xlane.xlu0 %658 }
 0x1b4   :  { %v548_v41 = vrot.slane %v547_v37, 2  ;;  %v660_v42 = vrot.slane %v659_v38, 4  ;;  %v526_v44 = vrot.slane %v525_v4, 1 }
 0x1b6   :  { %v661_v45 = vadd.f32 %v660_v42, %v659_v38  ;;  %v527_v46 = vadd.f32 %v526_v44, %v525_v4  ;;  %v549_v6 = vadd.f32 %v548_v41, %v547_v37 }
 0x1b8   :  { %v662_v47 = vrot.slane %v661_v45, 2  ;;  %711 = vpush %v527_v46  ;;  %v550_v48 = vrot.slane %v549_v6, 1 }
 0x1ba   :  { %v663_v56 = vadd.f32 %v662_v47, %v661_v45  ;;  %v551_v57 = vadd.f32 %v550_v48, %v549_v6 }
 0x1bc   :  { %713 = vpush %v551_v57  ;;  %v664_v58 = vrot.slane %v663_v56, 1 }
 0x1bd   :  { %715 = vpush %v582_v59 }
 0x1be   :  { %717 = vpush %v592_v13  ;;  %v665_v5 = vadd.f32 %v664_v58, %v663_v56 }
 0x1bf   :  { %719 = vpush %v605_v1 }
 0x1c0   :  { %721 = vpush %v665_v5 }
 0x1cb   :  { %s710_s4 = spop %709 }
 0x1cc   :  { %v505_v61 = vstv %s710_s4 }
 0x1cd   :  { %v506_v10 = vsel %vm504_vm9, %v505_v61, 0.0 }
 0x1e9   :  { %s712_s22 = spop %711 }
 0x1ea   :  { %v529_v51 = vstv %s712_s22 }
 0x1eb   :  { %v530_v9 = vsel %vm507_vm8, %v529_v51, 0.0 }
 0x1ec   :  { %v531_v17 = vadd.f32 %v530_v9, %v506_v10 }
 0x1ed   :  { %s714_s23 = spop %713 }
 0x1ee   :  { %s716_s24 = spop %715  ;;  %v553_v63 = vstv %s714_s23 }
 0x1ef   :  { %s718_s25 = spop %717  ;;  %v668_v60 = vstv %s716_s24  ;;  %v554_v15 = vsel %vm532_vm12, %v553_v63, 0.0 }
 0x1f0   :  { %s720_s26 = spop %719  ;;  %v675_v0 = vstv %s718_s25  ;;  %v669_v52 = vsel %vm667_vm13, %v668_v60, 0.0  ;;  %v555_v12 = vadd.f32 %v554_v15, %v531_v17 }
 0x1f1   :  { %s722_s27 = spop %721  ;;  %v679_v32 = vstv %s720_s26  ;;  %v676_v49 = vsel %vm674_vm3, %v675_v0, 0.0 }
 0x1f2   :  { %v671_v7 = vstv %s722_s27  ;;  %v680_v18 = vsel %vm678_vm4, %v679_v32, 0.0 }
 0x1f3   :  { %v672_v16 = vsel %vm670_vm14, %v671_v7, 0.0 }
 0x1f4   :  { %v673_v50 = vadd.f32 %v672_v16, %v669_v52 }
 0x1f6   :  { %v677_v62 = vadd.f32 %v676_v49, %v673_v50 }
 0x1f8   :  { %v681_v20 = vadd.f32 %v680_v18, %v677_v62 }
 0x1fa   :  { %v683_v19 = vadd.f32 %v681_v20, %v555_v12 }
 0x1fc   :  { %684 = vst [vmem:[#allocation7] sm:$0xff] %v683_v19 }
 0x1fd   :  { %824 = shalt.err (!%p821_p9)
}
 0x1fe   :  { %694 = dma.vmem_to_hbm [thread:$0]  %s692_s28, 128, %s1159_s6, [#allocation6]  }
 0x1ff   :  { %835 = dma.done.wait [#allocation6], 128  }
 0x200   :  { %836 = vsyncadd [#allocation6], 4294967168 }
 0x201   :  { %698 = vsyncpa [#allocation5], 1 }
 0x202   :  { %699 = vsyncpa [#allocation6], 1 }

</bundles_post_ra>
